<compile_context>
chip_gen: v6e
topology: v6e:2x2x1
jax: 0.10.0
libtpu: 0.0.40
codegen_flags: <defaults>
</compile_context>

<pallas_src>
import functools
import math

import jax
import jax.numpy as jnp
from jax import lax
from jax.experimental import pallas as pl
from jax.experimental.pallas import tpu as pltpu


def _albert_attn_kernel(x_ref, wqkv_ref, bqkv_ref, wd_ref, bd_ref,
                        ln_g_ref, ln_b_ref, out_ref,
                        qkv_ref, ctx_ref, *, num_heads, eps):
    x = x_ref[0]                                     # (S, H)
    H = x.shape[-1]
    d = H // num_heads
    inv_sqrt_d = 1.0 / math.sqrt(d)

    # Fused Q/K/V projection: one wide (S,H) x (H,3H) MXU matmul.
    qkv_ref[...] = (
        jnp.dot(x, wqkv_ref[...], preferred_element_type=jnp.float32)
        + bqkv_ref[...]
    )

    # Per-head attention; head h's context goes into lane slice [h*d:(h+1)*d).
    for h in range(num_heads):
        q = qkv_ref[:, pl.ds(h * d, d)]              # (S, d)
        k = qkv_ref[:, pl.ds(H + h * d, d)]          # (S, d)
        v = qkv_ref[:, pl.ds(2 * H + h * d, d)]      # (S, d)

        # scores = q @ k^T without materializing a transpose (NT dot_general).
        scores = lax.dot_general(
            q, k, (((1,), (1,)), ((), ())),
            preferred_element_type=jnp.float32) * inv_sqrt_d        # (S, S)

        scores = scores - scores.max(axis=-1, keepdims=True)
        p = jnp.exp(scores)
        denom = p.sum(axis=-1, keepdims=True)
        r = pl.reciprocal(denom, approx=True)        # EUP slot (cheap)
        r = r * (2.0 - denom * r)                    # one Newton step -> exact-ish
        probs = p * r

        ctx_ref[:, pl.ds(h * d, d)] = jnp.dot(
            probs, v, preferred_element_type=jnp.float32)           # (S, d)

    # Single output dense over the concatenated heads + residual + LayerNorm.
    proj = jnp.dot(ctx_ref[...], wd_ref[...],
                   preferred_element_type=jnp.float32) + bd_ref[...]  # (S, H)
    y = x.astype(jnp.float32) + proj
    mean = jnp.mean(y, axis=-1, keepdims=True)
    var = jnp.mean((y - mean) ** 2, axis=-1, keepdims=True)
    yn = (y - mean) * lax.rsqrt(var + eps)
    out_ref[0] = (yn * ln_g_ref[...] + ln_b_ref[...]).astype(out_ref.dtype)


def albert_attention(x, params, *, num_heads, eps=1e-12):
    B, S, H = x.shape
    assert H % num_heads == 0

    # Free layout plumbing in the wrapper (so the kernel never transposes):
    #   wqkv: (H_in, 3H)  -> kernel does x @ wqkv
    #   wd  : (H_in, H_out) -> kernel does ctx @ wd
    wqkv = jnp.concatenate(
        [params["wq"].T, params["wk"].T, params["wv"].T], axis=1)      # (H, 3H)
    bqkv = jnp.concatenate(
        [params["bq"], params["bk"], params["bv"]]).reshape(1, 3 * H)  # (1, 3H)
    wd = params["wd"].T                                                 # (H, H)
    bd = params["bd"].reshape(1, H)
    ln_g = params["ln_g"].reshape(1, H)
    ln_b = params["ln_b"].reshape(1, H)

    kernel = functools.partial(_albert_attn_kernel, num_heads=num_heads, eps=eps)

    batch_spec = pl.BlockSpec((1, S, H), lambda b: (b, 0, 0))
    const2 = lambda b: (0, 0)   # weight blocks: same block every step -> resident

    return pl.pallas_call(
        kernel,
        out_shape=jax.ShapeDtypeStruct((B, S, H), x.dtype),
        grid_spec=pltpu.PrefetchScalarGridSpec(
            num_scalar_prefetch=0,
            grid=(B,),
            in_specs=[batch_spec,
                      pl.BlockSpec((H, 3 * H), const2),
                      pl.BlockSpec((1, 3 * H), const2),
                      pl.BlockSpec((H, H), const2),
                      pl.BlockSpec((1, H), const2),
                      pl.BlockSpec((1, H), const2),
                      pl.BlockSpec((1, H), const2)],
            out_specs=batch_spec,
            scratch_shapes=[pltpu.VMEM((S, 3 * H), jnp.float32),   # fused QKV
                            pltpu.VMEM((S, H), jnp.float32)],      # concat ctx
        ),
        compiler_params=pltpu.CompilerParams(
            dimension_semantics=("parallel",)),
    )(x, wqkv, bqkv, wd, bd, ln_g, ln_b)


def albert_attention_ref(x, params, *, num_heads, eps=1e-12):
    """Plain-JAX reference mirroring the PyTorch forward (eval mode, no mask)."""
    B, S, H = x.shape
    d = H // num_heads
    q = x @ params["wq"].T + params["bq"]
    k = x @ params["wk"].T + params["bk"]
    v = x @ params["wv"].T + params["bv"]

    def split(t):  # (B, S, H) -> (B, nh, S, d)
        return t.reshape(B, S, num_heads, d).transpose(0, 2, 1, 3)

    q, k, v = split(q), split(k), split(v)
    scores = jnp.einsum("bhqd,bhkd->bhqk", q, k) / math.sqrt(d)
    probs = jax.nn.softmax(scores, axis=-1)
    ctx = jnp.einsum("bhqk,bhkd->bhqd", probs, v)
    ctx = ctx.transpose(0, 2, 1, 3).reshape(B, S, H)
    proj = ctx @ params["wd"].T + params["bd"]
    y = x + proj
    mean = y.mean(-1, keepdims=True)
    var = ((y - mean) ** 2).mean(-1, keepdims=True)
    yn = (y - mean) / jnp.sqrt(var + eps)
    return yn * params["ln_g"] + params["ln_b"]


if __name__ == "__main__":
    # Config: hidden=32, heads=4, head_dim=8, batch=2, seq=8
    B, S, H, NH = 2, 8, 32, 4
    key = jax.random.PRNGKey(0)
    ks = jax.random.split(key, 10)
    scale = 0.02

    params = {
        "wq": scale * jax.random.normal(ks[0], (H, H), jnp.float32),
        "bq": scale * jax.random.normal(ks[1], (H,), jnp.float32),
        "wk": scale * jax.random.normal(ks[2], (H, H), jnp.float32),
        "bk": scale * jax.random.normal(ks[3], (H,), jnp.float32),
        "wv": scale * jax.random.normal(ks[4], (H, H), jnp.float32),
        "bv": scale * jax.random.normal(ks[5], (H,), jnp.float32),
        "wd": scale * jax.random.normal(ks[6], (H, H), jnp.float32),
        "bd": scale * jax.random.normal(ks[7], (H,), jnp.float32),
        "ln_g": jnp.ones((H,), jnp.float32),
        "ln_b": jnp.zeros((H,), jnp.float32),
    }
    x = jax.random.normal(ks[8], (B, S, H), jnp.float32)

    out = albert_attention(x, params, num_heads=NH)
    out = jax.block_until_ready(out)

    ref = albert_attention_ref(x, params, num_heads=NH)
    assert out.shape == (B, S, H)
    assert jnp.allclose(out, ref, atol=1e-4, rtol=1e-4), "mismatch vs reference"
    print("KERNEL_OK")
</pallas_src>

<mosaic_0001>
module attributes {stable_mosaic.version = 11 : i64} {
  func.func @_albert_attn_kernel(%arg0: i32, %arg1: memref<1x8x32xf32, #tpu.memory_space<vmem>>, %arg2: memref<32x96xf32, #tpu.memory_space<vmem>>, %arg3: memref<1x96xf32, #tpu.memory_space<vmem>>, %arg4: memref<32x32xf32, #tpu.memory_space<vmem>>, %arg5: memref<1x32xf32, #tpu.memory_space<vmem>>, %arg6: memref<1x32xf32, #tpu.memory_space<vmem>>, %arg7: memref<1x32xf32, #tpu.memory_space<vmem>>, %arg8: memref<1x8x32xf32, #tpu.memory_space<vmem>>, %arg9: memref<8x96xf32, #tpu.memory_space<vmem>>, %arg10: memref<8x32xf32, #tpu.memory_space<vmem>>) attributes {dimension_semantics = [#tpu.dimension_semantics<parallel>], iteration_bounds = array<i64: 2>, scalar_prefetch = 0 : i64, scratch_operands = 2 : i64, tpu.core_type = #tpu.core_type<tc>, window_params = [{transform_indices = @transform_0, window_bounds = array<i64: 1, 8, 32>}, {pipeline_mode = #tpu.pipeline_mode<synchronous>, transform_indices = @transform_1, window_bounds = array<i64: 32, 96>}, {pipeline_mode = #tpu.pipeline_mode<synchronous>, transform_indices = @transform_2, window_bounds = array<i64: 1, 96>}, {pipeline_mode = #tpu.pipeline_mode<synchronous>, transform_indices = @transform_3, window_bounds = array<i64: 32, 32>}, {pipeline_mode = #tpu.pipeline_mode<synchronous>, transform_indices = @transform_4, window_bounds = array<i64: 1, 32>}, {pipeline_mode = #tpu.pipeline_mode<synchronous>, transform_indices = @transform_5, window_bounds = array<i64: 1, 32>}, {pipeline_mode = #tpu.pipeline_mode<synchronous>, transform_indices = @transform_6, window_bounds = array<i64: 1, 32>}, {transform_indices = @transform_7, window_bounds = array<i64: 1, 8, 32>}]} {
    %c0 = arith.constant 0 : index
    %c0_0 = arith.constant 0 : index
    %c0_1 = arith.constant 0 : index
    %0 = vector.load %arg1[%c0, %c0_0, %c0_1] : memref<1x8x32xf32, #tpu.memory_space<vmem>>, vector<1x8x32xf32>
    %1 = vector.shape_cast %0 : vector<1x8x32xf32> to vector<8x32xf32>
    %c0_2 = arith.constant 0 : index
    %c0_3 = arith.constant 0 : index
    %2 = vector.load %arg2[%c0_2, %c0_3] : memref<32x96xf32, #tpu.memory_space<vmem>>, vector<32x96xf32>
    %cst = arith.constant dense<0.000000e+00> : vector<8x96xf32>
    %3 = tpu.matmul %1, %2, %cst {dimension_numbers = #tpu.dot_dimension_numbers<[1], [0], [0], [1], [0, 0, 1, 1], [], []>} : vector<8x32xf32>, vector<32x96xf32>, vector<8x96xf32> -> vector<8x96xf32>
    %c0_4 = arith.constant 0 : index
    %c0_5 = arith.constant 0 : index
    %4 = vector.load %arg3[%c0_4, %c0_5] : memref<1x96xf32, #tpu.memory_space<vmem>>, vector<1x96xf32>
    %5 = vector.broadcast %4 : vector<1x96xf32> to vector<8x96xf32>
    %6 = arith.addf %3, %5 : vector<8x96xf32>
    %c0_6 = arith.constant 0 : index
    %c0_7 = arith.constant 0 : index
    %7 = vector.load %arg9[%c0_6, %c0_7] : memref<8x96xf32, #tpu.memory_space<vmem>>, vector<8x96xf32>
    tpu.vector_store %arg9[%c0_6, %c0_7], %6 {strides = array<i32>} : memref<8x96xf32, #tpu.memory_space<vmem>>, vector<8x96xf32>,
    %c0_8 = arith.constant 0 : index
    %c0_9 = arith.constant 0 : index
    %8 = vector.load %arg9[%c0_8, %c0_9] : memref<8x96xf32, #tpu.memory_space<vmem>>, vector<8x8xf32>
    %c0_10 = arith.constant 0 : index
    %c32 = arith.constant 32 : index
    %9 = vector.load %arg9[%c0_10, %c32] : memref<8x96xf32, #tpu.memory_space<vmem>>, vector<8x8xf32>
    %c0_11 = arith.constant 0 : index
    %c64 = arith.constant 64 : index
    %10 = vector.load %arg9[%c0_11, %c64] : memref<8x96xf32, #tpu.memory_space<vmem>>, vector<8x8xf32>
    %cst_12 = arith.constant dense<0.000000e+00> : vector<8x8xf32>
    %11 = tpu.matmul %8, %9, %cst_12 {dimension_numbers = #tpu.dot_dimension_numbers<[1], [1], [0], [0], [0, 0, 1, 0], [], []>} : vector<8x8xf32>, vector<8x8xf32>, vector<8x8xf32> -> vector<8x8xf32>
    %cst_13 = arith.constant 0.353553385 : f32
    %12 = vector.broadcast %cst_13 : f32 to vector<8x8xf32>
    %13 = arith.mulf %11, %12 : vector<8x8xf32>
    %cst_14 = arith.constant dense<0xFF800000> : vector<8xf32>
    %14 = vector.multi_reduction <maximumf>, %13, %cst_14 [1] : vector<8x8xf32> to vector<8xf32>
    %15 = vector.shape_cast %14 : vector<8xf32> to vector<8x1xf32>
    %16 = vector.broadcast %15 : vector<8x1xf32> to vector<8x8xf32>
    %17 = arith.subf %13, %16 : vector<8x8xf32>
    %18 = math.exp %17 : vector<8x8xf32>
    %cst_15 = arith.constant dense<0.000000e+00> : vector<8xf32>
    %19 = vector.multi_reduction <add>, %18, %cst_15 [1] : vector<8x8xf32> to vector<8xf32>
    %20 = vector.shape_cast %19 : vector<8xf32> to vector<8x1xf32>
    %21 = tpu.reciprocal %20 {approx = true} : vector<8x1xf32> -> vector<8x1xf32>
    %22 = arith.mulf %20, %21 : vector<8x1xf32>
    %cst_16 = arith.constant 2.000000e+00 : f32
    %23 = vector.broadcast %cst_16 : f32 to vector<8x1xf32>
    %24 = arith.subf %23, %22 : vector<8x1xf32>
    %25 = arith.mulf %21, %24 : vector<8x1xf32>
    %26 = vector.broadcast %25 : vector<8x1xf32> to vector<8x8xf32>
    %27 = arith.mulf %18, %26 : vector<8x8xf32>
    %cst_17 = arith.constant dense<0.000000e+00> : vector<8x8xf32>
    %28 = tpu.matmul %27, %10, %cst_17 {dimension_numbers = #tpu.dot_dimension_numbers<[1], [0], [0], [1], [0, 0, 1, 1], [], []>} : vector<8x8xf32>, vector<8x8xf32>, vector<8x8xf32> -> vector<8x8xf32>
    %c0_18 = arith.constant 0 : index
    %c0_19 = arith.constant 0 : index
    %29 = vector.load %arg10[%c0_18, %c0_19] : memref<8x32xf32, #tpu.memory_space<vmem>>, vector<8x8xf32>
    tpu.vector_store %arg10[%c0_18, %c0_19], %28 {strides = array<i32>} : memref<8x32xf32, #tpu.memory_space<vmem>>, vector<8x8xf32>,
    %c0_20 = arith.constant 0 : index
    %c8 = arith.constant 8 : index
    %30 = vector.load %arg9[%c0_20, %c8] : memref<8x96xf32, #tpu.memory_space<vmem>>, vector<8x8xf32>
    %c0_21 = arith.constant 0 : index
    %c40 = arith.constant 40 : index
    %31 = vector.load %arg9[%c0_21, %c40] : memref<8x96xf32, #tpu.memory_space<vmem>>, vector<8x8xf32>
    %c0_22 = arith.constant 0 : index
    %c72 = arith.constant 72 : index
    %32 = vector.load %arg9[%c0_22, %c72] : memref<8x96xf32, #tpu.memory_space<vmem>>, vector<8x8xf32>
    %cst_23 = arith.constant dense<0.000000e+00> : vector<8x8xf32>
    %33 = tpu.matmul %30, %31, %cst_23 {dimension_numbers = #tpu.dot_dimension_numbers<[1], [1], [0], [0], [0, 0, 1, 0], [], []>} : vector<8x8xf32>, vector<8x8xf32>, vector<8x8xf32> -> vector<8x8xf32>
    %cst_24 = arith.constant 0.353553385 : f32
    %34 = vector.broadcast %cst_24 : f32 to vector<8x8xf32>
    %35 = arith.mulf %33, %34 : vector<8x8xf32>
    %cst_25 = arith.constant dense<0xFF800000> : vector<8xf32>
    %36 = vector.multi_reduction <maximumf>, %35, %cst_25 [1] : vector<8x8xf32> to vector<8xf32>
    %37 = vector.shape_cast %36 : vector<8xf32> to vector<8x1xf32>
    %38 = vector.broadcast %37 : vector<8x1xf32> to vector<8x8xf32>
    %39 = arith.subf %35, %38 : vector<8x8xf32>
    %40 = math.exp %39 : vector<8x8xf32>
    %cst_26 = arith.constant dense<0.000000e+00> : vector<8xf32>
    %41 = vector.multi_reduction <add>, %40, %cst_26 [1] : vector<8x8xf32> to vector<8xf32>
    %42 = vector.shape_cast %41 : vector<8xf32> to vector<8x1xf32>
    %43 = tpu.reciprocal %42 {approx = true} : vector<8x1xf32> -> vector<8x1xf32>
    %44 = arith.mulf %42, %43 : vector<8x1xf32>
    %cst_27 = arith.constant 2.000000e+00 : f32
    %45 = vector.broadcast %cst_27 : f32 to vector<8x1xf32>
    %46 = arith.subf %45, %44 : vector<8x1xf32>
    %47 = arith.mulf %43, %46 : vector<8x1xf32>
    %48 = vector.broadcast %47 : vector<8x1xf32> to vector<8x8xf32>
    %49 = arith.mulf %40, %48 : vector<8x8xf32>
    %cst_28 = arith.constant dense<0.000000e+00> : vector<8x8xf32>
    %50 = tpu.matmul %49, %32, %cst_28 {dimension_numbers = #tpu.dot_dimension_numbers<[1], [0], [0], [1], [0, 0, 1, 1], [], []>} : vector<8x8xf32>, vector<8x8xf32>, vector<8x8xf32> -> vector<8x8xf32>
    %c0_29 = arith.constant 0 : index
    %c8_30 = arith.constant 8 : index
    %51 = vector.load %arg10[%c0_29, %c8_30] : memref<8x32xf32, #tpu.memory_space<vmem>>, vector<8x8xf32>
    tpu.vector_store %arg10[%c0_29, %c8_30], %50 {strides = array<i32>} : memref<8x32xf32, #tpu.memory_space<vmem>>, vector<8x8xf32>,
    %c0_31 = arith.constant 0 : index
    %c16 = arith.constant 16 : index
    %52 = vector.load %arg9[%c0_31, %c16] : memref<8x96xf32, #tpu.memory_space<vmem>>, vector<8x8xf32>
    %c0_32 = arith.constant 0 : index
    %c48 = arith.constant 48 : index
    %53 = vector.load %arg9[%c0_32, %c48] : memref<8x96xf32, #tpu.memory_space<vmem>>, vector<8x8xf32>
    %c0_33 = arith.constant 0 : index
    %c80 = arith.constant 80 : index
    %54 = vector.load %arg9[%c0_33, %c80] : memref<8x96xf32, #tpu.memory_space<vmem>>, vector<8x8xf32>
    %cst_34 = arith.constant dense<0.000000e+00> : vector<8x8xf32>
    %55 = tpu.matmul %52, %53, %cst_34 {dimension_numbers = #tpu.dot_dimension_numbers<[1], [1], [0], [0], [0, 0, 1, 0], [], []>} : vector<8x8xf32>, vector<8x8xf32>, vector<8x8xf32> -> vector<8x8xf32>
    %cst_35 = arith.constant 0.353553385 : f32
    %56 = vector.broadcast %cst_35 : f32 to vector<8x8xf32>
    %57 = arith.mulf %55, %56 : vector<8x8xf32>
    %cst_36 = arith.constant dense<0xFF800000> : vector<8xf32>
    %58 = vector.multi_reduction <maximumf>, %57, %cst_36 [1] : vector<8x8xf32> to vector<8xf32>
    %59 = vector.shape_cast %58 : vector<8xf32> to vector<8x1xf32>
    %60 = vector.broadcast %59 : vector<8x1xf32> to vector<8x8xf32>
    %61 = arith.subf %57, %60 : vector<8x8xf32>
    %62 = math.exp %61 : vector<8x8xf32>
    %cst_37 = arith.constant dense<0.000000e+00> : vector<8xf32>
    %63 = vector.multi_reduction <add>, %62, %cst_37 [1] : vector<8x8xf32> to vector<8xf32>
    %64 = vector.shape_cast %63 : vector<8xf32> to vector<8x1xf32>
    %65 = tpu.reciprocal %64 {approx = true} : vector<8x1xf32> -> vector<8x1xf32>
    %66 = arith.mulf %64, %65 : vector<8x1xf32>
    %cst_38 = arith.constant 2.000000e+00 : f32
    %67 = vector.broadcast %cst_38 : f32 to vector<8x1xf32>
    %68 = arith.subf %67, %66 : vector<8x1xf32>
    %69 = arith.mulf %65, %68 : vector<8x1xf32>
    %70 = vector.broadcast %69 : vector<8x1xf32> to vector<8x8xf32>
    %71 = arith.mulf %62, %70 : vector<8x8xf32>
    %cst_39 = arith.constant dense<0.000000e+00> : vector<8x8xf32>
    %72 = tpu.matmul %71, %54, %cst_39 {dimension_numbers = #tpu.dot_dimension_numbers<[1], [0], [0], [1], [0, 0, 1, 1], [], []>} : vector<8x8xf32>, vector<8x8xf32>, vector<8x8xf32> -> vector<8x8xf32>
    %c0_40 = arith.constant 0 : index
    %c16_41 = arith.constant 16 : index
    %73 = vector.load %arg10[%c0_40, %c16_41] : memref<8x32xf32, #tpu.memory_space<vmem>>, vector<8x8xf32>
    tpu.vector_store %arg10[%c0_40, %c16_41], %72 {strides = array<i32>} : memref<8x32xf32, #tpu.memory_space<vmem>>, vector<8x8xf32>,
    %c0_42 = arith.constant 0 : index
    %c24 = arith.constant 24 : index
    %74 = vector.load %arg9[%c0_42, %c24] : memref<8x96xf32, #tpu.memory_space<vmem>>, vector<8x8xf32>
    %c0_43 = arith.constant 0 : index
    %c56 = arith.constant 56 : index
    %75 = vector.load %arg9[%c0_43, %c56] : memref<8x96xf32, #tpu.memory_space<vmem>>, vector<8x8xf32>
    %c0_44 = arith.constant 0 : index
    %c88 = arith.constant 88 : index
    %76 = vector.load %arg9[%c0_44, %c88] : memref<8x96xf32, #tpu.memory_space<vmem>>, vector<8x8xf32>
    %cst_45 = arith.constant dense<0.000000e+00> : vector<8x8xf32>
    %77 = tpu.matmul %74, %75, %cst_45 {dimension_numbers = #tpu.dot_dimension_numbers<[1], [1], [0], [0], [0, 0, 1, 0], [], []>} : vector<8x8xf32>, vector<8x8xf32>, vector<8x8xf32> -> vector<8x8xf32>
    %cst_46 = arith.constant 0.353553385 : f32
    %78 = vector.broadcast %cst_46 : f32 to vector<8x8xf32>
    %79 = arith.mulf %77, %78 : vector<8x8xf32>
    %cst_47 = arith.constant dense<0xFF800000> : vector<8xf32>
    %80 = vector.multi_reduction <maximumf>, %79, %cst_47 [1] : vector<8x8xf32> to vector<8xf32>
    %81 = vector.shape_cast %80 : vector<8xf32> to vector<8x1xf32>
    %82 = vector.broadcast %81 : vector<8x1xf32> to vector<8x8xf32>
    %83 = arith.subf %79, %82 : vector<8x8xf32>
    %84 = math.exp %83 : vector<8x8xf32>
    %cst_48 = arith.constant dense<0.000000e+00> : vector<8xf32>
    %85 = vector.multi_reduction <add>, %84, %cst_48 [1] : vector<8x8xf32> to vector<8xf32>
    %86 = vector.shape_cast %85 : vector<8xf32> to vector<8x1xf32>
    %87 = tpu.reciprocal %86 {approx = true} : vector<8x1xf32> -> vector<8x1xf32>
    %88 = arith.mulf %86, %87 : vector<8x1xf32>
    %cst_49 = arith.constant 2.000000e+00 : f32
    %89 = vector.broadcast %cst_49 : f32 to vector<8x1xf32>
    %90 = arith.subf %89, %88 : vector<8x1xf32>
    %91 = arith.mulf %87, %90 : vector<8x1xf32>
    %92 = vector.broadcast %91 : vector<8x1xf32> to vector<8x8xf32>
    %93 = arith.mulf %84, %92 : vector<8x8xf32>
    %cst_50 = arith.constant dense<0.000000e+00> : vector<8x8xf32>
    %94 = tpu.matmul %93, %76, %cst_50 {dimension_numbers = #tpu.dot_dimension_numbers<[1], [0], [0], [1], [0, 0, 1, 1], [], []>} : vector<8x8xf32>, vector<8x8xf32>, vector<8x8xf32> -> vector<8x8xf32>
    %c0_51 = arith.constant 0 : index
    %c24_52 = arith.constant 24 : index
    %95 = vector.load %arg10[%c0_51, %c24_52] : memref<8x32xf32, #tpu.memory_space<vmem>>, vector<8x8xf32>
    tpu.vector_store %arg10[%c0_51, %c24_52], %94 {strides = array<i32>} : memref<8x32xf32, #tpu.memory_space<vmem>>, vector<8x8xf32>,
    %c0_53 = arith.constant 0 : index
    %c0_54 = arith.constant 0 : index
    %96 = vector.load %arg10[%c0_53, %c0_54] : memref<8x32xf32, #tpu.memory_space<vmem>>, vector<8x32xf32>
    %c0_55 = arith.constant 0 : index
    %c0_56 = arith.constant 0 : index
    %97 = vector.load %arg4[%c0_55, %c0_56] : memref<32x32xf32, #tpu.memory_space<vmem>>, vector<32x32xf32>
    %cst_57 = arith.constant dense<0.000000e+00> : vector<8x32xf32>
    %98 = tpu.matmul %96, %97, %cst_57 {dimension_numbers = #tpu.dot_dimension_numbers<[1], [0], [0], [1], [0, 0, 1, 1], [], []>} : vector<8x32xf32>, vector<32x32xf32>, vector<8x32xf32> -> vector<8x32xf32>
    %c0_58 = arith.constant 0 : index
    %c0_59 = arith.constant 0 : index
    %99 = vector.load %arg5[%c0_58, %c0_59] : memref<1x32xf32, #tpu.memory_space<vmem>>, vector<1x32xf32>
    %100 = vector.broadcast %99 : vector<1x32xf32> to vector<8x32xf32>
    %101 = arith.addf %98, %100 : vector<8x32xf32>
    %102 = arith.addf %1, %101 : vector<8x32xf32>
    %cst_60 = arith.constant dense<0.000000e+00> : vector<8xf32>
    %103 = vector.multi_reduction <add>, %102, %cst_60 [1] : vector<8x32xf32> to vector<8xf32>
    %104 = vector.shape_cast %103 : vector<8xf32> to vector<8x1xf32>
    %cst_61 = arith.constant 3.200000e+01 : f32
    %105 = vector.broadcast %cst_61 : f32 to vector<8x1xf32>
    %106 = arith.divf %104, %105 : vector<8x1xf32>
    %107 = vector.broadcast %106 : vector<8x1xf32> to vector<8x32xf32>
    %108 = arith.subf %102, %107 : vector<8x32xf32>
    %109 = arith.mulf %108, %108 : vector<8x32xf32>
    %cst_62 = arith.constant dense<0.000000e+00> : vector<8xf32>
    %110 = vector.multi_reduction <add>, %109, %cst_62 [1] : vector<8x32xf32> to vector<8xf32>
    %111 = vector.shape_cast %110 : vector<8xf32> to vector<8x1xf32>
    %cst_63 = arith.constant 3.200000e+01 : f32
    %112 = vector.broadcast %cst_63 : f32 to vector<8x1xf32>
    %113 = arith.divf %111, %112 : vector<8x1xf32>
    %114 = vector.broadcast %106 : vector<8x1xf32> to vector<8x32xf32>
    %115 = arith.subf %102, %114 : vector<8x32xf32>
    %cst_64 = arith.constant 9.99999996E-13 : f32
    %116 = vector.broadcast %cst_64 : f32 to vector<8x1xf32>
    %117 = arith.addf %113, %116 : vector<8x1xf32>
    %118 = math.rsqrt %117 : vector<8x1xf32>
    %119 = vector.broadcast %118 : vector<8x1xf32> to vector<8x32xf32>
    %120 = arith.mulf %115, %119 : vector<8x32xf32>
    %c0_65 = arith.constant 0 : index
    %c0_66 = arith.constant 0 : index
    %121 = vector.load %arg6[%c0_65, %c0_66] : memref<1x32xf32, #tpu.memory_space<vmem>>, vector<1x32xf32>
    %122 = vector.broadcast %121 : vector<1x32xf32> to vector<8x32xf32>
    %123 = arith.mulf %120, %122 : vector<8x32xf32>
    %c0_67 = arith.constant 0 : index
    %c0_68 = arith.constant 0 : index
    %124 = vector.load %arg7[%c0_67, %c0_68] : memref<1x32xf32, #tpu.memory_space<vmem>>, vector<1x32xf32>
    %125 = vector.broadcast %124 : vector<1x32xf32> to vector<8x32xf32>
    %126 = arith.addf %123, %125 : vector<8x32xf32>
    %c0_69 = arith.constant 0 : index
    %c0_70 = arith.constant 0 : index
    %c0_71 = arith.constant 0 : index
    %127 = vector.load %arg8[%c0_69, %c0_70, %c0_71] : memref<1x8x32xf32, #tpu.memory_space<vmem>>, vector<1x8x32xf32>
    %128 = vector.shape_cast %127 : vector<1x8x32xf32> to vector<8x32xf32>
    %129 = vector.shape_cast %126 : vector<8x32xf32> to vector<1x8x32xf32>
    tpu.vector_store %arg8[%c0_69, %c0_70, %c0_71], %129 {strides = array<i32>} : memref<1x8x32xf32, #tpu.memory_space<vmem>>, vector<1x8x32xf32>,
    return
  }
  func.func @transform_0(%arg0: i32) -> (i32, i32, i32) {
    %c0_i32 = arith.constant 0 : i32
    %c0_i32_0 = arith.constant 0 : i32
    %c0_i32_1 = arith.constant 0 : i32
    return %arg0, %c0_i32, %c0_i32_0 : i32, i32, i32
  }
  func.func @transform_1(%arg0: i32) -> (i32, i32) {
    %c0_i32 = arith.constant 0 : i32
    %c0_i32_0 = arith.constant 0 : i32
    %c0_i32_1 = arith.constant 0 : i32
    return %c0_i32, %c0_i32_0 : i32, i32
  }
  func.func @transform_2(%arg0: i32) -> (i32, i32) {
    %c0_i32 = arith.constant 0 : i32
    %c0_i32_0 = arith.constant 0 : i32
    %c0_i32_1 = arith.constant 0 : i32
    return %c0_i32, %c0_i32_0 : i32, i32
  }
  func.func @transform_3(%arg0: i32) -> (i32, i32) {
    %c0_i32 = arith.constant 0 : i32
    %c0_i32_0 = arith.constant 0 : i32
    %c0_i32_1 = arith.constant 0 : i32
    return %c0_i32, %c0_i32_0 : i32, i32
  }
  func.func @transform_4(%arg0: i32) -> (i32, i32) {
    %c0_i32 = arith.constant 0 : i32
    %c0_i32_0 = arith.constant 0 : i32
    %c0_i32_1 = arith.constant 0 : i32
    return %c0_i32, %c0_i32_0 : i32, i32
  }
  func.func @transform_5(%arg0: i32) -> (i32, i32) {
    %c0_i32 = arith.constant 0 : i32
    %c0_i32_0 = arith.constant 0 : i32
    %c0_i32_1 = arith.constant 0 : i32
    return %c0_i32, %c0_i32_0 : i32, i32
  }
  func.func @transform_6(%arg0: i32) -> (i32, i32) {
    %c0_i32 = arith.constant 0 : i32
    %c0_i32_0 = arith.constant 0 : i32
    %c0_i32_1 = arith.constant 0 : i32
    return %c0_i32, %c0_i32_0 : i32, i32
  }
  func.func @transform_7(%arg0: i32) -> (i32, i32, i32) {
    %c0_i32 = arith.constant 0 : i32
    %c0_i32_0 = arith.constant 0 : i32
    %c0_i32_1 = arith.constant 0 : i32
    return %arg0, %c0_i32, %c0_i32_0 : i32, i32, i32
  }
}

</mosaic_0001>

<bundles_post_ra>
// kernel: tpu_custom_call.1
= control target key start
LH: loop header
LB: loop body
LE: loop exit
PB: predicated region body
PF: predicated region fallthrough
CT: control target
= control target key end

     0   :  { %s2031_s0 = inlined_call_operand.hbm [shape: f32[2,8,32], index: 0, kind: input, shape index: {}]   ;;  %s2032_s1 = inlined_call_operand.hbm [shape: f32[32,96], index: 1, kind: input, shape index: {}]   ;;  %s2033_s2 = inlined_call_operand.vmem [shape: f32[1,96], index: 2, kind: input, shape index: {}]   ;;  %s2034_s3 = inlined_call_operand.hbm [shape: f32[32,32], index: 3, kind: input, shape index: {}]   ;;  %s2035_s4 = inlined_call_operand.vmem [shape: f32[1,32], index: 4, kind: input, shape index: {}]   ;;  %s2036_s5 = inlined_call_operand.vmem [shape: f32[1,32], index: 5, kind: input, shape index: {}]   ;;  %s2037_s6 = inlined_call_operand.vmem [shape: f32[1,32], index: 6, kind: input, shape index: {}]   ;;  %s2038_s7 = inlined_call_operand.hbm [shape: f32[2,8,32], index: 7, kind: output, shape index: {}]  }
   0x1   :  { %2043 = sst [smem:[#allocation14_spill]] %s2032_s1 }
   0x2   :  { %2044 = sst [smem:[#allocation15_spill]] %s2034_s3 }
   0x3   :  { %12 = vsyncpa [#allocation5], 0 }
   0x4   :  { %14 = vsyncpa [#allocation5 + $0x1], 0 }
   0x5   :  { %15 = vsyncpa [#allocation8], 0 }
   0x6   :  { %16 = vsyncpa [#allocation6], 0 }
   0x7   :  { %18 = vsyncpa [#allocation6 + $0x1], 0  ;;  %s1770_s24 = smov 0   ;;  %s1772_s25 = smov 0  }
   0x8   :  { %s1774_s26 = smov 0   ;;  %s1776_s27 = smov 0  }
   0x9 LB: > { %s1791_s28 = sadd.s32 4294967295, %s1706_s27   ;;  %s1333_s29 = sadd.s32 4294967294, %s1706_s27   ;;  %s1706_s27 = sphi %s1776_s27, %s2064_s27   ;;  %s1702_s26 = sphi %s1774_s26, %s2063_s26   ;;  %s1698_s25 = sphi %s1772_s25, %s2062_s25   ;;  %s1694_s24 = sphi %s1770_s24, %s2061_s24  }
   0xa   : > { %p44_p0 = scmp.ne.s32.totalorder %s1698_s25, %s1694_s24  ;;  %p2039_p1 = scmp.eq.s32.totalorder %s1791_s28, 0 }
   0xb   : > { %p200_p3 = scmp.eq.s32.totalorder %s1333_s29, 1  ;;  %p1334_p5 = scmp.ge.s32.totalorder %s1706_s27, 1 }
   0xc   : > { %p1800_p4 = por %p2039_p1, %p44_p0  ;;  %p207_p7 = scmp.lt.s32.totalorder %s1706_s27, 3 }
   0xd   : > { %p1805_p6 = por %p200_p3, %p44_p0  ;;  %s1708_s10 = smov [#allocation7]  }
   0xe   : > { %s2045_s30 = scalar_select %p1800_p4, 1, 0 }
   0xf   : > { %s2046_s8 = scalar_select %p1805_p6, 1, 0 }
  0x10   : > { %p1810_p8 = pnand %p1334_p5, %p207_p7  ;;  %s219_s11 = sshll.u32 %s1708_s10, 4  ;;  %s220_s11 = int_to_ptr.vmem [resolvable:$true] %s219_s11 }
  0x11   : > { %s1709_s13 = smov [#allocation9]   ;;  %s1569_s15 = scalar_lea.vmem %s220_s11, 512 }
  0x12   : > { %s2047_s9 = scalar_select %p1810_p8, 1, 0 }
  0x13   : > { %p1467_p9 = pneg %p1810_p8  ;;  %s235_s14 = sshll.u32 %s1709_s13, 4  ;;  %s236_s14 = int_to_ptr.vmem [resolvable:$true] %s235_s14 }
  0x14   : > { %p1570_p13 = scmp.ne.s32.totalorder %s220_s11, %s1569_s15  ;;  %p1577_p5 = scmp.lt.s32.totalorder %s220_s11, %s220_s11 }
  0x15   : > { %p1819_p11 = pnand %p1467_p9, %p2039_p1  ;;  %p1578_p7 = scmp.lt.s32.totalorder %s1569_s15, %s1569_s15 }
  0x17   : > { %p1560_p12 = pneg %p1819_p11  ;;  %p1579_p10 = por %p1578_p7, %p1577_p5 }
  0x19   : > { %p1572_p0 = pnand %p1570_p13, %p1560_p12 }
  0x1b   : > { %p1573_p3 = pneg %p1572_p0 }
  0x1d   : > { %p1580_p9 = pnand %p1579_p10, %p1573_p3 }
  0x1f   : > { %1583 = shalt.err (!%p1580_p9)
}
  0x20   : > { %s1710_s16 = smov 128   ;;  %s1711_s17 = smov 8  }
  0x21   : > { %s2049_s1 = sld [smem:[#allocation14_spill]]  ;;  %s1595_s20 = scalar_lea.vmem %s236_s14, 512 }
  0x22   : > { %p1596_p1 = scmp.ne.s32.totalorder %s236_s14, %s1595_s20  ;;  %p1603_p2 = scmp.lt.s32.totalorder %s236_s14, %s236_s14 }
  0x23   : > { %p1604_p6 = scmp.lt.s32.totalorder %s1595_s20, %s1595_s20 }
  0x24   : > { %p1598_p13 = pnand %p1596_p1, %p1560_p12 }
  0x25   : > { %p1605_p5 = por %p1604_p6, %p1603_p2 }
  0x26   : > { %p1599_p0 = pneg %p1598_p13 }
  0x27   : > { %1470 = dma.hbm_to_vmem [thread:$0]  (!%p1819_p11), %s2049_s1, 512, %s220_s11, [#allocation8], %s1710_s16, %s1710_s16, %s1711_s17  }
  0x28   : > { %p1606_p10 = pnand %p1605_p5, %p1599_p0 }
  0x2a   : > { %1609 = shalt.err (!%p1606_p10)
}
  0x2b   : > { %s2050_s3 = sld [smem:[#allocation15_spill]]  ;;  %s1842_s23 = sadd.s32 1, %s1706_s27  }
  0x2c   : > { %s31_s29 = sadd.s32 1, %s1702_s26  ;;  %s28_s10 = ssub.s32 %s1706_s27, %s1842_s23 }
  0x2d   : > { %p38_p1 = scmp.ne.s32.totalorder %s1702_s26, %s1698_s25  ;;  %p29_p2 = scmp.eq.s32.totalorder %s28_s10, 0 }
  0x2e   : > { %p39_p6 = scmp.eq.s32.totalorder %s1706_s27, 0  ;;  %p2051_p12 = scmp.eq.s32.totalorder %s1791_s28, 1 }
  0x2f   : > { %p1484_p7 = scmp.lt.s32.totalorder %s1706_s27, 2  ;;  %s258_s13 = sand.u32 1, %s1702_s26  }
  0x30   : > { %p1852_p3 = por %p2051_p12, %p38_p1  ;;  %p40_p9 = por %p39_p6, %p38_p1 }
  0x31   : > { %1473 = dma.hbm_to_vmem [thread:$0]  (!%p1819_p11), %s2050_s3, 512, %s236_s14, [#allocation8], %s1710_s16, %s1710_s16, %s1711_s17  }
  0x32   : > { %s2052_s11 = scalar_select %p1852_p3, 1, 0 }
  0x33   : > { %s1858_s12 = scalar_select %p29_p2, %s1702_s26, %s31_s29  }
  0x34   : > { %s1338_s15 = sshll.u32 %s258_s13, 3  ;;  %s1339_s14 = sshll.u32 %s1706_s27, 7 }
  0x35   : > { %s1865_s18 = scalar_lea.hbm %s2031_s0, %s1339_s14  ;;  %s262_s19 = scalar_lea.vmem [#allocation4], %s1338_s15 }
  0x36   : > { %s269_s20 = sshll.u32 %s262_s19, 4  ;;  %p1867_p11 = pnand %p1484_p7, %p40_p9  ;;  %s270_s20 = int_to_ptr.vmem [resolvable:$true] %s269_s20 }
  0x37   : > { %s259_s22 = scalar_lea.sflag [#allocation5], %s258_s13  ;;  %s1610_s29 = scalar_lea.hbm %s1865_s18, 128 }
  0x38   : > { %p1611_p13 = scmp.ne.s32.totalorder %s1865_s18, %s1610_s29  ;;  %p1612_p0 = pneg %p1867_p11 }
  0x39   : > { %s1615_s16 = scalar_lea.hbm %s2031_s0, 256  ;;  %p1616_p1 = scmp.lt.s32.totalorder %s1865_s18, %s2031_s0 }
  0x3a   : > { %p1613_p5 = pnand %p1612_p0, %p1611_p13  ;;  %p1617_p2 = scmp.lt.s32.totalorder %s1615_s16, %s1610_s29 }
  0x3c   : > { %p1614_p10 = pneg %p1613_p5  ;;  %p1618_p6 = por %p1617_p2, %p1616_p1 }
  0x3e   : > { %p1619_p12 = pnand %p1618_p6, %p1614_p10 }
  0x40   : > { %1622 = shalt.err (!%p1619_p12)
}
  0x41   : > { %s1623_s19 = scalar_lea.vmem %s270_s20, 128  ;;  %s1712_s13 = smov [#allocation4]  }
  0x42   : > { %p1624_p7 = scmp.ne.s32.totalorder %s270_s20, %s1623_s19  ;;  %s1628_s1 = sshll.u32 %s1712_s13, 4  ;;  %s1629_s1 = int_to_ptr.vmem [resolvable:$false] %s1628_s1 }
  0x43   : > { %s1630_s3 = scalar_lea.vmem %s1629_s1, 256  ;;  %p1631_p13 = scmp.lt.s32.totalorder %s270_s20, %s1629_s1 }
  0x44   : > { %p1626_p9 = pnand %p1624_p7, %p1612_p0  ;;  %p1632_p5 = scmp.lt.s32.totalorder %s1630_s3, %s1623_s19 }
  0x46   : > { %p1627_p3 = pneg %p1626_p9  ;;  %p1633_p4 = por %p1632_p5, %p1631_p13 }
  0x48   : > { %p1634_p8 = pnand %p1633_p4, %p1627_p3 }
  0x4a   : > { %1637 = shalt.err (!%p1634_p8)
}
  0x4b   : > { %1477 = dma.hbm_to_vmem [thread:$0]  (!%p1867_p11), %s1865_s18, 128, %s270_s20, %s259_s22  }
  0x4c   : > { %p2054_p10 = scmp.ne.s32.totalorder %s2047_s9, 0 }
  0x4d   : > { %s1888_s29 = sand.u32 (!%p2054_p10), 1, %s1698_s25   ;;  %p2055_p4 = scmp.ne.s32.totalorder (!%p2054_p10), %s2045_s30, 0 }
  0x4e   : > { %278 = sbr.rel (%p2054_p10) target bundleno = 2290 (0x8f2), region = 48  ;;  %s1341_s10 = sshll.u32 (!%p2054_p10), %s1888_s29, 3 }
  0x4f   : > { %s281_s1 = scalar_lea.sflag (!%p2054_p10), [#allocation5], %s1888_s29  ;;  %s284_s3 = scalar_lea.vmem (!%p2054_p10), [#allocation4], %s1341_s10 }
  0x53   : > { %1681 = dma.done.wait (%p2055_p4), %s281_s1, 128  }
  0x54   : > { %1683 = vsyncadd (%p2055_p4), %s281_s1, 4294967168  ;;  %p2056_p8 = scmp.eq.s32.totalorder %s1791_s28, 0 }
  0x56   : > { %1685 = dma.done.wait (%p2056_p8), [#allocation8], 1024   ;;  %p2057_p3 = pmov %p2056_p8 }
  0x57   : > { %v1713_v0 = vmov 0.0   ;;  %vm1714_vm0 = vmmov 0   ;;  %v327_v1 = vld [vmem:[#allocation7 + $0x18] sm:$0xff]  ;;  %v326_v2 = vld [vmem:[#allocation7 + $0x10] sm:$0xff]  ;;  %v325_v3 = vld [vmem:[#allocation7 + $0x8] sm:$0xff]  ;;  %vm335_vm1 = vcmask 261120  }
  0x58   : > { %1687 = vsyncadd (%p2057_p3), [#allocation8], 4294966272  ;;  %1393 = vmatprep.subr.mxu0 %v1713_v0  ;;  %1401 = vmatprep.mubr.msk.f32.mxu0 %vm1714_vm0, %v1713_v0  ;;  %v324_v4 = vld [vmem:[#allocation7] sm:$0xff]  ;;  %v1910_v5 = vld [vmem:[%s284_s3] sm:$0xff]  ;;  %vm409_vm2 = vcmask 785408   ;;  %s1715_s18 = smov 64  }
  0x59   : > { %1404 = vmatprep.subr.mxu1 %v1713_v0  ;;  %1406 = vmatprep.mubr.msk.f32.mxu1 %vm1714_vm0, %v1713_v0  ;;  %v1345_v6 = vld [vmem:[%s2033_s2] ss:$0 sm:$0xff]  ;;  %s1716_s20 = smov 96   ;;  %s1717_s21 = smov 88   ;;  %vm415_vm3 = vcmask 64512   ;;  %vm757_vm4 = vcmask 130112  }
  0x5a   : > { %1394 = vmatpush3.msra.mxu0 %v327_v1  ;;  %s1718_s22 = smov 72   ;;  %s1719_s14 = smov 120   ;;  %vm934_vm5 = vcmask 195712   ;;  %vm1111_vm6 = vcmask 261312  }
  0x5b   : > { %1395 = vmatprep.subr.mxu0 %v1713_v0  ;;  %s1720_s16 = smov 80   ;;  %s1721_s17 = smov 112  }
  0x5c   : > { %1396 = vmatpush3.msra.mxu0 %v326_v2  ;;  %s1722_s15 = smov 104   ;;  %s1723_s19 = smov 56  }
  0x5d   : > { %1397 = vmatprep.subr.mxu0 %v1713_v0  ;;  %s1724_s13 = smov 40   ;;  %s1725_s1 = smov 48  }
  0x5e   : > { %1398 = vmatpush3.msra.mxu0 %v325_v3  ;;  %s1726_s3 = smov 8   ;;  %s1727_s30 = smov 16  }
  0x5f   : > { %1399 = vmatprep.subr.mxu0 %v1713_v0  ;;  %s1728_s9 = smov 24   ;;  %p2058_p0 = scmp.ne.s32.totalorder %s2052_s11, 0 }
  0x60   : > { %1400 = vmatpush3.msra.mxu0 %v324_v4 }
  0x61   : > { %1402 = vmatmul.mubr.msk.f32.vlgmr.msra.gmra.mxu0 %vm335_vm1, %v1910_v5  ;;  %1424 = vmatprep.subr.mxu0 %v1713_v0 }
  0x62   : > { %1426 = vmatprep.mubr.msk.f32.mxu0 %vm1714_vm0, %v1713_v0 }
 0x121   : > { %v405_v7 = vpop.f32.mrf.mxu0 }
 0x122   : > { %v406_v8 = vadd.f32 %v1345_v6, %v405_v7 }
 0x123   : > { %v1403_v9 = vpop.f32.mrf.mxu0 }
 0x124   : > { %410 = vst.msk [vmem:[#allocation2] sm:$0xff] %vm409_vm2, %v406_v8 }
 0x12b   : > { %v1921_v10 = vld [vmem:[#allocation2] sm:$0xff] }
 0x12c   : > { %505 = vrot.lane.b32.xlu1 %v1921_v10, %s1715_s18  ;;  %413 = vrot.lane.b32.xlu0 %v1921_v10, %s1716_s20  ;;  %s1729_s18 = smov [#allocation10]  }
 0x130   : > { %586 = vrot.lane.b32.xlu1 %v1921_v10, %s1717_s21 }
 0x19e   : > { %v414_v11 = vpop.permute.xlu0 %413  ;;  %v506_v12 = vpop.permute.xlu1 %505 }
 0x19f   : > { %1405 = vmatpush3.xpose.msk.msra.mxu1 %vm415_vm3, %v414_v11 }
 0x1a0   : > { %1409 = vmatprep.subr.mxu1 %v1713_v0 }
 0x1a2   : > { %1407 = vmatmul.mubr.msk.f32.vlgmr.msra.gmra.mxu1 %vm415_vm3, %v1921_v10  ;;  %v587_v22 = vpop.permute.xlu1 %586 }
 0x1a3   : > { %1410 = vmatpush3.msra.mxu1 %v506_v12  ;;  %1411 = vmatprep.mubr.msk.f32.mxu1 %vm1714_vm0, %v1713_v0 }
 0x1a4   : > { %1414 = vmatprep.subr.mxu1 %v1713_v0 }
 0x262   : > { %v486_v13 = vpop.f32.mrf.mxu1 }
 0x263   : > { %v490_v14 = vmul.f32 0.35355338, %v486_v13 }
 0x264   : > { %v1408_v15 = vpop.f32.mrf.mxu1 }
 0x265   : > { %v491_v16 = vsel %vm415_vm3, %v490_v14, -inf }
 0x266   : > { %492 = vmax.xlane.f32.xlu0 %v491_v16 }
 0x27c   : > { %940 = vrot.lane.b32.xlu0 %v1921_v10, %s1718_s22 }
 0x2ef   : > { %v493_v17 = vpop.xlane.xlu0 %492 }
 0x2f0   : > { %v494_v18 = vsub.f32 %v490_v14, %v493_v17 }
 0x2f2   : > { %v495_v19 = vmul.f32 1.442695, %v494_v18 }
 0x2f3   : > { %v941_v27 = vpop.permute.xlu0 %940 }
 0x2f4   : > { %1540 = vpow2.f32 %v495_v19 }
 0x301   : > { %v1541_v20 = vpop.eup %1540 }
 0x302   : > { %v497_v21 = vsel %vm415_vm3, %v1541_v20, 0.0 }
 0x303   : > { %498 = vadd.xlane.f32.xlu1 %v497_v21 }
 0x314   : > { %584 = vrot.lane.b32.xlu1 %v1921_v10, %s1719_s14 }
 0x318   : > { %763 = vrot.lane.b32.xlu1 %v1921_v10, %s1720_s16 }
 0x31c   : > { %761 = vrot.lane.b32.xlu1 %v1921_v10, %s1721_s17  ;;  %s1364_s17 = sshll.u32 %s1791_s28, 7  ;;  %s1642_s28 = sshll.u32 %s1729_s18, 4  ;;  %s1643_s28 = int_to_ptr.vmem [resolvable:$false] %s1642_s28 }
 0x320   : > { %938 = vrot.lane.b32.xlu1 %v1921_v10, %s1722_s15  ;;  %s322_s15 = scalar_lea.vmem [#allocation10], %s1341_s10  ;;  %s1644_s10 = scalar_lea.vmem %s1643_s28, 256 }
 0x38c   : > { %v499_v23 = vpop.xlane.xlu1 %498 }
 0x38d   : > { %1542 = vrcp.f32 %v499_v23 }
 0x390   : > { %v585_v24 = vpop.permute.xlu1 %584 }
 0x394   : > { %v764_v25 = vpop.permute.xlu1 %763 }
 0x395   : > { %1425 = vmatpush3.xpose.msk.msra.mxu0 %vm415_vm3, %v764_v25 }
 0x396   : > { %1434 = vmatprep.subr.mxu0 %v1713_v0 }
 0x398   : > { %v762_v26 = vpop.permute.xlu1 %761 }
 0x399   : > { %1427 = vmatmul.mubr.msk.f32.vlgmr.msra.gmra.mxu0 %vm415_vm3, %v762_v26  ;;  %v1114_v26 = vld [vmem:[#allocation9] sm:$0xff] }
 0x39a   : > { %v1543_v28 = vpop.eup %1542  ;;  %1435 = vmatpush3.xpose.msk.msra.mxu0 %vm415_vm3, %v941_v27  ;;  %1436 = vmatprep.mubr.msk.f32.mxu0 %vm1714_vm0, %v1713_v0 }
 0x39b   : > { %v501_v29 = vmul.f32 %v1543_v28, %v499_v23  ;;  %1444 = vmatprep.subr.mxu0 %v1713_v0  ;;  %v1116_v23 = vld [vmem:[#allocation9 + $0x10] sm:$0xff] }
 0x39c   : > { %v939_v30 = vpop.permute.xlu1 %938 }
 0x39d   : > { %v502_v31 = vsub.f32 2.0, %v501_v29  ;;  %1437 = vmatmul.mubr.msk.f32.vlgmr.msra.gmra.mxu0 %vm415_vm3, %v939_v30 }
 0x39e   : > { %1452 = vmatprep.mubr.msk.f32.mxu0 %vm1714_vm0, %v1713_v0 }
 0x39f   : > { %v503_v32 = vmul.f32 %v1543_v28, %v502_v31 }
 0x3a1   : > { %v504_v33 = vmul.f32 %v1541_v20, %v503_v32 }
 0x3a3   : > { %1412 = vmatmul.mubr.msk.f32.vlgmr.msra.gmra.mxu1 %vm415_vm3, %v504_v33 }
 0x3a4   : > { %1415 = vmatpush3.xpose.msk.msra.mxu1 %vm415_vm3, %v587_v22  ;;  %1416 = vmatprep.mubr.msk.f32.mxu1 %vm1714_vm0, %v1713_v0  ;;  %v1117_v22 = vld [vmem:[#allocation9 + $0x18] sm:$0xff] }
 0x3a5   : > { %1419 = vmatprep.subr.mxu1 %v1713_v0  ;;  %1445 = vmatpush3.msra.mxu0 %v1117_v22 }
 0x3a6   : > { %1446 = vmatprep.subr.mxu0 %v1713_v0 }
 0x3a7   : > { %1417 = vmatmul.mubr.msk.f32.vlgmr.msra.gmra.mxu1 %vm415_vm3, %v585_v24  ;;  %v1115_v24 = vld [vmem:[#allocation9 + $0x8] sm:$0xff]  ;;  %1447 = vmatpush3.msra.mxu0 %v1116_v23 }
 0x3a8   : > { %1421 = vmatprep.mubr.msk.f32.mxu1 %vm1714_vm0, %v1713_v0  ;;  %1448 = vmatprep.subr.mxu0 %v1713_v0 }
 0x3a9   : > { %1449 = vmatpush3.msra.mxu0 %v1115_v24 }
 0x3aa   : > { %1450 = vmatprep.subr.mxu0 %v1713_v0 }
 0x3ab   : > { %1451 = vmatpush3.msra.mxu0 %v1114_v26 }
 0x459   : > { %v835_v34 = vpop.f32.mrf.mxu0 }
 0x45a   : > { %v839_v35 = vmul.f32 0.35355338, %v835_v34 }
 0x45b   : > { %v1428_v36 = vpop.f32.mrf.mxu0 }
 0x45c   : > { %v840_v37 = vsel %vm415_vm3, %v839_v35, -inf }
 0x45d   : > { %841 = vmax.xlane.f32.xlu0 %v840_v37  ;;  %v1012_v38 = vpop.f32.mrf.mxu0 }
 0x45e   : > { %v1016_v45 = vmul.f32 0.35355338, %v1012_v38 }
 0x45f   : > { %v1438_v39 = vpop.f32.mrf.mxu0 }
 0x460   : > { %v1017_v47 = vsel %vm415_vm3, %v1016_v45, -inf }
 0x463   : > { %v577_v40 = vpop.f32.mrf.mxu1 }
 0x464   : > { %581 = vst.msk [vmem:[#allocation3] sm:$0xff] %vm415_vm3, %v577_v40 }
 0x465   : > { %v1413_v41 = vpop.f32.mrf.mxu1 }
 0x467   : > { %v658_v42 = vpop.f32.mrf.mxu1 }
 0x468   : > { %v662_v43 = vmul.f32 0.35355338, %v658_v42 }
 0x469   : > { %v1418_v44 = vpop.f32.mrf.mxu1 }
 0x46a   : > { %v663_v46 = vsel %vm415_vm3, %v662_v43, -inf }
 0x46b   : > { %664 = vmax.xlane.f32.xlu1 %v663_v46 }
 0x46f   : > { %1018 = vmax.xlane.f32.xlu1 %v1017_v47 }
 0x4e6   : > { %v842_v48 = vpop.xlane.xlu0 %841 }
 0x4e7   : > { %v843_v49 = vsub.f32 %v839_v35, %v842_v48 }
 0x4e9   : > { %v844_v50 = vmul.f32 1.442695, %v843_v49 }
 0x4eb   : > { %1544 = vpow2.f32 %v844_v50 }
 0x4f4   : > { %v665_v51 = vpop.xlane.xlu1 %664 }
 0x4f5   : > { %v666_v52 = vsub.f32 %v662_v43, %v665_v51  ;;  %v1362_v51 = vld [vmem:[%s2037_s6] ss:$0 sm:$0xff] }
 0x4f7   : > { %v667_v53 = vmul.f32 1.442695, %v666_v52 }
 0x4f8   : > { %v1545_v54 = vpop.eup %1544  ;;  %v1019_v55 = vpop.xlane.xlu1 %1018 }
 0x4f9   : > { %1546 = vpow2.f32 %v667_v53  ;;  %v1020_v56 = vsub.f32 %v1016_v45, %v1019_v55  ;;  %v846_v57 = vsel %vm415_vm3, %v1545_v54, 0.0 }
 0x4fa   : > { %847 = vadd.xlane.f32.xlu1 %v846_v57 }
 0x4fb   : > { %v1021_v58 = vmul.f32 1.442695, %v1020_v56 }
 0x4fd   : > { %1548 = vpow2.f32 %v1021_v58 }
 0x506   : > { %v1547_v59 = vpop.eup %1546 }
 0x507   : > { %v669_v60 = vsel %vm415_vm3, %v1547_v59, 0.0 }
 0x508   : > { %670 = vadd.xlane.f32.xlu1 %v669_v60 }
 0x50a   : > { %v1549_v61 = vpop.eup %1548 }
 0x50b   : > { %v1023_v62 = vsel %vm415_vm3, %v1549_v61, 0.0 }
 0x50c   : > { %1024 = vadd.xlane.f32.xlu0 %v1023_v62 }
 0x519   : > { %677 = vrot.lane.b32.xlu1 %v1921_v10, %s1723_s19  ;;  %s1244_s19 = sshll.u32 %s322_s15, 4  ;;  %s1245_s19 = int_to_ptr.vmem [resolvable:$true] %s1244_s19 }
 0x51a   : > { %p1645_p6 = scmp.lt.s32.totalorder %s1245_s19, %s1643_s28 }
 0x51d   : > { %1031 = vrot.lane.b32.xlu1 %v1921_v10, %s1724_s13 }
 0x522   : > { %854 = vrot.lane.b32.xlu0 %v1921_v10, %s1725_s1 }
 0x583   : > { %v848_v63 = vpop.xlane.xlu1 %847 }
 0x584   : > { %1550 = vrcp.f32 %v848_v63 }
 0x591   : > { %v671_v1 = vpop.xlane.xlu1 %670  ;;  %v1551_v4 = vpop.eup %1550 }
 0x592   : > { %1552 = vrcp.f32 %v671_v1  ;;  %v850_v6 = vmul.f32 %v1551_v4, %v848_v63 }
 0x594   : > { %v851_v9 = vsub.f32 2.0, %v850_v6 }
 0x595   : > { %v1025_v2 = vpop.xlane.xlu0 %1024  ;;  %v678_v3 = vpop.permute.xlu1 %677 }
 0x596   : > { %1554 = vrcp.f32 %v1025_v2  ;;  %1420 = vmatpush3.msra.mxu1 %v678_v3  ;;  %v852_v10 = vmul.f32 %v1551_v4, %v851_v9 }
 0x597   : > { %1429 = vmatprep.subr.mxu1 %v1713_v0 }
 0x598   : > { %v853_v18 = vmul.f32 %v1545_v54, %v852_v10 }
 0x599   : > { %v855_v17 = vpop.permute.xlu0 %854  ;;  %v1032_v20 = vpop.permute.xlu1 %1031 }
 0x59f   : > { %v1553_v7 = vpop.eup %1552 }
 0x5a0   : > { %v673_v8 = vmul.f32 %v1553_v7, %v671_v1 }
 0x5a2   : > { %v674_v11 = vsub.f32 2.0, %v673_v8 }
 0x5a3   : > { %v1555_v12 = vpop.eup %1554 }
 0x5a4   : > { %v675_v13 = vmul.f32 %v1553_v7, %v674_v11  ;;  %v1027_v14 = vmul.f32 %v1555_v12, %v1025_v2 }
 0x5a6   : > { %v676_v15 = vmul.f32 %v1547_v59, %v675_v13  ;;  %v1028_v16 = vsub.f32 2.0, %v1027_v14 }
 0x5a8   : > { %1422 = vmatmul.mubr.msk.f32.vlgmr.msra.gmra.mxu1 %vm415_vm3, %v676_v15  ;;  %v1029_v19 = vmul.f32 %v1555_v12, %v1028_v16 }
 0x5a9   : > { %1430 = vmatpush3.msra.mxu1 %v855_v17  ;;  %1431 = vmatprep.mubr.msk.f32.mxu1 %vm1714_vm0, %v1713_v0 }
 0x5aa   : > { %1439 = vmatprep.subr.mxu1 %v1713_v0  ;;  %v1030_v21 = vmul.f32 %v1549_v61, %v1029_v19 }
 0x5ac   : > { %1432 = vmatmul.mubr.msk.f32.vlgmr.msra.gmra.mxu1 %vm415_vm3, %v853_v18 }
 0x5ad   : > { %1440 = vmatpush3.msra.mxu1 %v1032_v20  ;;  %1441 = vmatprep.mubr.msk.f32.mxu1 %vm1714_vm0, %v1713_v0  ;;  %v1359_v0 = vld [vmem:[%s2035_s4] ss:$0 sm:$0xff] }
 0x5b0   : > { %1442 = vmatmul.mubr.msk.f32.vlgmr.msra.gmra.mxu1 %vm415_vm3, %v1030_v21 }
 0x668   : > { %v749_v25 = vpop.f32.mrf.mxu1 }
 0x669   : > { %754 = vrot.lane.b32.xlu1 %v749_v25, %s1726_s3  ;;  %s1242_s3 = scalar_lea.hbm %s2038_s7, %s1364_s17 }
 0x66a   : > { %v1423_v27 = vpop.f32.mrf.mxu1 }
 0x66c   : > { %v926_v28 = vpop.f32.mrf.mxu1 }
 0x66d   : > { %931 = vrot.lane.b32.xlu0 %v926_v28, %s1727_s30  ;;  %s1231_s30 = scalar_lea.sflag [#allocation6], %s1888_s29 }
 0x66e   : > { %v1433_v29 = vpop.f32.mrf.mxu1 }
 0x670   : > { %v1103_v30 = vpop.f32.mrf.mxu1 }
 0x671   : > { %1108 = vrot.lane.b32.xlu1 %v1103_v30, %s1728_s9  ;;  %s1638_s9 = scalar_lea.vmem %s1245_s19, 128 }
 0x672   : > { %v1443_v31 = vpop.f32.mrf.mxu1  ;;  %p1639_p11 = scmp.ne.s32.totalorder %s1245_s19, %s1638_s9  ;;  %p1646_p12 = scmp.lt.s32.totalorder %s1644_s10, %s1638_s9 }
 0x674   : > { %p1640_p1 = pnand %p1639_p11, %p2058_p0  ;;  %p1647_p7 = por %p1646_p12, %p1645_p6 }
 0x676   : > { %p1641_p2 = pneg %p1640_p1 }
 0x678   : > { %p1648_p9 = pnand %p1647_p7, %p1641_p2 }
 0x6db   : > { %v755_v32 = vpop.permute.xlu1 %754 }
 0x6dc   : > { %758 = vst.msk [vmem:[#allocation3] sm:$0xff] %vm757_vm4, %v755_v32 }
 0x6df   : > { %v932_v33 = vpop.permute.xlu0 %931 }
 0x6e0   : > { %935 = vst.msk [vmem:[#allocation3] sm:$0xff] %vm934_vm5, %v932_v33 }
 0x6e3   : > { %v1109_v34 = vpop.permute.xlu1 %1108 }
 0x6e4   : > { %1112 = vst.msk [vmem:[#allocation3] sm:$0xff] %vm1111_vm6, %v1109_v34 }
 0x6eb   : > { %v1113_v35 = vld [vmem:[#allocation3] sm:$0xff] }
 0x6ec   : > { %1453 = vmatmul.mubr.msk.f32.vlgmr.msra.gmra.mxu0 %vm335_vm1, %v1113_v35 }
 0x7ac   : > { %v1194_v36 = vpop.f32.mrf.mxu0 }
 0x7ad   : > { %v1195_v37 = vadd.f32 %v1359_v0, %v1194_v36 }
 0x7ae   : > { %v1454_v38 = vpop.f32.mrf.mxu0 }
 0x7af   : > { %v1198_v39 = vadd.f32 %v1195_v37, %v1910_v5  ;;  %v1361_v5 = vld [vmem:[%s2036_s5] ss:$0 sm:$0xff] }
 0x7b1   : > { %v1199_v40 = vsel %vm335_vm1, %v1198_v39, 0.0 }
 0x7b2   : > { %1200 = vadd.xlane.f32.xlu0 %v1199_v40 }
 0x83b   : > { %v1201_v41 = vpop.xlane.xlu0 %1200 }
 0x83c   : > { %v1203_v42 = vmul.f32 0.03125, %v1201_v41 }
 0x83e   : > { %v1204_v43 = vsub.f32 %v1198_v39, %v1203_v42 }
 0x840   : > { %v1205_v44 = vmul.f32 %v1204_v43, %v1204_v43 }
 0x842   : > { %v1206_v45 = vsel %vm335_vm1, %v1205_v44, 0.0 }
 0x843   : > { %1207 = vadd.xlane.f32.xlu1 %v1206_v45 }
 0x8cc   : > { %v1208_v46 = vpop.xlane.xlu1 %1207 }
 0x8cd   : > { %v1209_v47 = vmul.f32 0.03125, %v1208_v46 }
 0x8cf   : > { %v1210_v48 = vadd.f32 1e-12, %v1209_v47 }
 0x8d1   : > { %1556 = vrsqrt.f32 %v1210_v48 }
 0x8de   : > { %v1557_v49 = vpop.eup %1556 }
 0x8df   : > { %v1212_v50 = vmul.f32 %v1557_v49, %v1204_v43 }
 0x8e1   : > { %v1220_v52 = vmul.f32 %v1361_v5, %v1212_v50 }
 0x8e3   : > { %v1228_v53 = vadd.f32 %v1362_v51, %v1220_v52 }
 0x8e5   : > { %1229 = vst.msk [vmem:[%s322_s15] sm:$0xff] %vm335_vm1, %v1228_v53 }
 0x8e6   : > { %1651 = shalt.err (!%p1648_p9)
}
 0x8e7   : > { %s1652_s20 = scalar_lea.hbm %s1242_s3, 128  ;;  %s1656_s22 = scalar_lea.hbm %s2038_s7, 256 }
 0x8e8   : > { %p1653_p13 = scmp.ne.s32.totalorder %s1242_s3, %s1652_s20  ;;  %p1657_p4 = scmp.lt.s32.totalorder %s1242_s3, %s2038_s7 }
 0x8e9   : > { %p1658_p8 = scmp.lt.s32.totalorder %s1656_s22, %s1652_s20 }
 0x8ea   : > { %p1654_p5 = pnand %p1653_p13, %p2058_p0 }
 0x8eb   : > { %p1659_p3 = por %p1658_p8, %p1657_p4 }
 0x8ec   : > { %p1655_p10 = pneg %p1654_p5 }
 0x8ee   : > { %p1660_p11 = pnand %p1659_p3, %p1655_p10 }
 0x8f0   : > { %1663 = shalt.err (!%p1660_p11)
}
 0x8f1   : > { %1465 = dma.vmem_to_hbm [thread:$0]  (%p2058_p0), %s1245_s19, 128, %s1242_s3, %s1231_s30  }
 0x8f2 PF: > { %s1256_s17 = sand.u32 1, %s1694_s24   ;;  %p2059_p1 = scmp.ne.s32.totalorder %s2046_s8, 0 }
 0x8f3   : > { %p2060_p2 = scmp.ge.s32.totalorder %s1706_s27, 2  ;;  %s1257_s15 = scalar_lea.sflag [#allocation6], %s1256_s17 }
 0x8f5   : > { %p1479_p6 = pnand %p2060_p2, %p2059_p1 }
 0x8f7   : > { %p1480_p12 = pneg %p1479_p6 }
 0x8f9   : > { %1689 = dma.done.wait (%p1480_p12), %s1257_s15, 128  }
 0x8fa   : > { %1691 = vsyncadd (%p1480_p12), %s1257_s15, 4294967168  ;;  %p21_p7 = scmp.ge.s32.totalorder %s1842_s23, 4   ;;  %s2061_s24 = smov %s1698_s25 }
 0x8fb   : > { %s2062_s25 = smov %s1702_s26  ;;  %s2063_s26 = smov %s1858_s12 }
 0x8fc   : > { %s2064_s27 = smov %s1842_s23  ;;  %23 = sbr.rel (!%p21_p7) target bundleno = 9 (0x9), region = 101 }
 0x901   :  { %1262 = vsyncpa [#allocation5], 1 }
 0x902   :  { %1264 = vsyncpa [#allocation5 + $0x1], 1 }
 0x903   :  { %1265 = vsyncpa [#allocation8], 1 }
 0x904   :  { %1266 = vsyncpa [#allocation6], 1 }
 0x905   :  { %1268 = vsyncpa [#allocation6 + $0x1], 1 }

</bundles_post_ra>
